<compile_context>
chip_gen: v7x
topology: tpu7x:2x2x1
jax: 0.10.0
libtpu: 0.0.40
codegen_flags: <defaults>
</compile_context>

<pallas_src>
import functools

import jax
import jax.numpy as jnp
from jax.experimental import pallas as pl
from jax.experimental.pallas import tpu as pltpu


def _round_up(x, m):
    return ((x + m - 1) // m) * m


def _vmem_capacity_bytes():
    """Physical VMEM per TensorCore; device-kind-based fallback if query fails."""
    try:
        info = pltpu.get_tpu_info()
        cap = getattr(info, "vmem_capacity_bytes", None)
        if cap:
            return int(cap)
    except Exception:
        pass
    try:
        kind = jax.devices()[0].device_kind.lower()
        if "v7" in kind:
            return 64 * 1024 * 1024
        if "v5" in kind or "v6" in kind:
            return 128 * 1024 * 1024
    except Exception:
        pass
    return 64 * 1024 * 1024  # conservative (v7x-sized) default


def _pick_row_tile(rows, emb_dim, itemsize, budget_bytes, *, min_steps=2):
    """Largest row tile (multiple of the sublane packing) fitting the budget.

    Live-set model per row: 2x double-buffered input + output tiles in the I/O
    dtype (4 * itemsize) plus ~6 tile-sized f32 temporaries for the f32 cast,
    centered values, squared values, scaled output, and broadcasts.
    Also capped so the grid has at least `min_steps` steps (megacore on v7x).
    """
    sublane = max(8, 32 // itemsize)  # 8 for f32, 16 for bf16, 32 for int8
    per_row_bytes = emb_dim * (4 * itemsize + 6 * 4)
    max_rows_budget = max(sublane, budget_bytes // per_row_bytes)
    # Keep at least `min_steps` grid steps so both v7x TensorCores get work.
    max_rows_split = _round_up(pl.cdiv(rows, min_steps), sublane)
    # Bigger blocks amortize the ~0.35us per-step overhead; allow larger tiles
    # for small emb where a tile is only a couple of MiB.
    cap = 2048 if emb_dim <= 512 else 1024
    row_tile = min(cap, max_rows_budget, max_rows_split, _round_up(rows, sublane))
    row_tile = max(sublane, (row_tile // sublane) * sublane)
    return int(row_tile)


def _layernorm_kernel(x_ref, g_ref, b_ref, o_ref, *, eps, emb_dim):
    # x_ref: (row_tile, emb_dim); g_ref/b_ref: (1, emb_dim).
    # Last dim equals the full array extent, so Mosaic masks any lane tail in
    # both the reduction and the store; no explicit masking needed.
    x = x_ref[...].astype(jnp.float32)
    mu = jnp.mean(x, axis=-1, keepdims=True)
    d = x - mu
    var = jnp.sum(d * d, axis=-1, keepdims=True) * jnp.float32(1.0 / (emb_dim - 1))
    sigma = jnp.sqrt(var)
    # Per-row reciprocal on a (rows, 1) column; approx=False keeps full
    # precision for tight tolerances (EUP approx ~2^-12 rel err).
    inv = pl.reciprocal(sigma + jnp.float32(eps), approx=False)

    gain = g_ref[...].astype(jnp.float32)
    bias = b_ref[...].astype(jnp.float32)
    o_ref[...] = (gain * (d * inv) + bias).astype(o_ref.dtype)


def layer_norm(x, gain, bias, *, epsilon=1e-6, row_tile=None):
    """LayerNorm over the last dim, matching the PyTorch module semantics."""
    orig_shape = x.shape
    emb_dim = orig_shape[-1]
    assert emb_dim >= 2, "emb_dim must be >= 2 (unbiased std divides by emb-1)"

    x2d = x.reshape(-1, emb_dim)
    rows = x2d.shape[0]
    g2d = gain.reshape(1, emb_dim)
    b2d = bias.reshape(1, emb_dim)

    itemsize = jnp.dtype(x.dtype).itemsize
    vmem_cap = _vmem_capacity_bytes()
    # Scoped-VMEM limit: well above the 16 MiB v5e default, headroom on v7x.
    vmem_limit = int(min(vmem_cap * 3 // 4, 112 * 1024 * 1024))
    if row_tile is None:
        row_tile = _pick_row_tile(rows, emb_dim, itemsize, (vmem_limit * 85) // 100)

    grid = (pl.cdiv(rows, row_tile),)  # partial last block handled by Pallas

    kernel = functools.partial(_layernorm_kernel, eps=epsilon, emb_dim=emb_dim)

    # Mem-bound: ~1 read + 1 write of x plus tiny params; ~10 VALU ops/elem.
    cost = pl.CostEstimate(
        flops=10 * rows * emb_dim,
        transcendentals=0,
        bytes_accessed=2 * rows * emb_dim * itemsize + 2 * emb_dim * itemsize,
    )

    # TODO(synk): if emb_dim << 128 is a real production shape, repack rows
    # onto lanes (transpose layout) to recover the wasted 128-lane fraction.
    out = pl.pallas_call(
        kernel,
        out_shape=jax.ShapeDtypeStruct((rows, emb_dim), x.dtype),
        grid_spec=pltpu.PrefetchScalarGridSpec(
            num_scalar_prefetch=0,
            grid=grid,
            in_specs=[
                pl.BlockSpec((row_tile, emb_dim), lambda i: (i, 0)),
                pl.BlockSpec((1, emb_dim), lambda i: (0, 0)),
                pl.BlockSpec((1, emb_dim), lambda i: (0, 0)),
            ],
            out_specs=pl.BlockSpec((row_tile, emb_dim), lambda i: (i, 0)),
        ),
        compiler_params=pltpu.CompilerParams(
            dimension_semantics=("parallel",),
            vmem_limit_bytes=vmem_limit,
        ),
        cost_estimate=cost,
    )(x2d, g2d, b2d)

    return out.reshape(orig_shape)


if __name__ == "__main__":
    key = jax.random.PRNGKey(0)
    batch, seq, emb_dim = 2, 8, 32

    x = jax.random.normal(key, (batch, seq, emb_dim), dtype=jnp.float32)

    # Deterministic parameter init matching nn.Parameter(torch.ones/zeros(emb_dim))
    gain = jnp.ones((emb_dim,), dtype=jnp.float32)
    bias = jnp.zeros((emb_dim,), dtype=jnp.float32)

    out = layer_norm(x, gain, bias, epsilon=1e-6)
    out = jax.block_until_ready(out)

    # Reference check (pure JAX, mirrors torch semantics: unbiased std, eps on sigma)
    mu = jnp.mean(x, axis=-1, keepdims=True)
    sigma = jnp.sqrt(jnp.sum((x - mu) ** 2, axis=-1, keepdims=True) / (emb_dim - 1))
    ref = gain * (x - mu) / (sigma + 1e-6) + bias
    assert jnp.allclose(out, ref, atol=1e-5, rtol=1e-5), "mismatch vs reference"

    print("KERNEL_OK")
</pallas_src>

<mosaic_0001>
module attributes {stable_mosaic.version = 11 : i64} {
  func.func @_layernorm_kernel(%arg0: i32, %arg1: memref<8x32xf32, #tpu.memory_space<vmem>>, %arg2: memref<1x32xf32, #tpu.memory_space<vmem>>, %arg3: memref<1x32xf32, #tpu.memory_space<vmem>>, %arg4: memref<8x32xf32, #tpu.memory_space<vmem>>) attributes {dimension_semantics = [#tpu.dimension_semantics<parallel>], iteration_bounds = array<i64: 2>, scalar_prefetch = 0 : i64, scratch_operands = 0 : i64, tpu.core_type = #tpu.core_type<tc>, window_params = [{transform_indices = @transform_0, window_bounds = array<i64: 8, 32>}, {pipeline_mode = #tpu.pipeline_mode<synchronous>, transform_indices = @transform_1, window_bounds = array<i64: 1, 32>}, {pipeline_mode = #tpu.pipeline_mode<synchronous>, transform_indices = @transform_2, window_bounds = array<i64: 1, 32>}, {transform_indices = @transform_3, window_bounds = array<i64: 8, 32>}]} {
    %c0 = arith.constant 0 : index
    %c0_0 = arith.constant 0 : index
    %0 = vector.load %arg1[%c0, %c0_0] : memref<8x32xf32, #tpu.memory_space<vmem>>, vector<8x32xf32>
    %cst = arith.constant dense<0.000000e+00> : vector<8xf32>
    %1 = vector.multi_reduction <add>, %0, %cst [1] : vector<8x32xf32> to vector<8xf32>
    %2 = vector.shape_cast %1 : vector<8xf32> to vector<8x1xf32>
    %cst_1 = arith.constant 3.200000e+01 : f32
    %3 = vector.broadcast %cst_1 : f32 to vector<8x1xf32>
    %4 = arith.divf %2, %3 : vector<8x1xf32>
    %5 = vector.broadcast %4 : vector<8x1xf32> to vector<8x32xf32>
    %6 = arith.subf %0, %5 : vector<8x32xf32>
    %7 = arith.mulf %6, %6 : vector<8x32xf32>
    %cst_2 = arith.constant dense<0.000000e+00> : vector<8xf32>
    %8 = vector.multi_reduction <add>, %7, %cst_2 [1] : vector<8x32xf32> to vector<8xf32>
    %9 = vector.shape_cast %8 : vector<8xf32> to vector<8x1xf32>
    %cst_3 = arith.constant 0.0322580636 : f32
    %10 = vector.broadcast %cst_3 : f32 to vector<8x1xf32>
    %11 = arith.mulf %9, %10 : vector<8x1xf32>
    %12 = math.sqrt %11 : vector<8x1xf32>
    %cst_4 = arith.constant 9.99999997E-7 : f32
    %13 = vector.broadcast %cst_4 : f32 to vector<8x1xf32>
    %14 = arith.addf %12, %13 : vector<8x1xf32>
    %15 = tpu.reciprocal %14 : vector<8x1xf32> -> vector<8x1xf32>
    %c0_5 = arith.constant 0 : index
    %c0_6 = arith.constant 0 : index
    %16 = vector.load %arg2[%c0_5, %c0_6] : memref<1x32xf32, #tpu.memory_space<vmem>>, vector<1x32xf32>
    %c0_7 = arith.constant 0 : index
    %c0_8 = arith.constant 0 : index
    %17 = vector.load %arg3[%c0_7, %c0_8] : memref<1x32xf32, #tpu.memory_space<vmem>>, vector<1x32xf32>
    %18 = vector.broadcast %15 : vector<8x1xf32> to vector<8x32xf32>
    %19 = arith.mulf %6, %18 : vector<8x32xf32>
    %20 = vector.broadcast %16 : vector<1x32xf32> to vector<8x32xf32>
    %21 = arith.mulf %20, %19 : vector<8x32xf32>
    %22 = vector.broadcast %17 : vector<1x32xf32> to vector<8x32xf32>
    %23 = arith.addf %21, %22 : vector<8x32xf32>
    %c0_9 = arith.constant 0 : index
    %c0_10 = arith.constant 0 : index
    %24 = vector.load %arg4[%c0_9, %c0_10] : memref<8x32xf32, #tpu.memory_space<vmem>>, vector<8x32xf32>
    tpu.vector_store %arg4[%c0_9, %c0_10], %23 {strides = array<i32>} : memref<8x32xf32, #tpu.memory_space<vmem>>, vector<8x32xf32>,
    return
  }
  func.func @transform_0(%arg0: i32) -> (i32, i32) {
    %c0_i32 = arith.constant 0 : i32
    %c0_i32_0 = arith.constant 0 : i32
    return %arg0, %c0_i32 : i32, i32
  }
  func.func @transform_1(%arg0: i32) -> (i32, i32) {
    %c0_i32 = arith.constant 0 : i32
    %c0_i32_0 = arith.constant 0 : i32
    %c0_i32_1 = arith.constant 0 : i32
    return %c0_i32, %c0_i32_0 : i32, i32
  }
  func.func @transform_2(%arg0: i32) -> (i32, i32) {
    %c0_i32 = arith.constant 0 : i32
    %c0_i32_0 = arith.constant 0 : i32
    %c0_i32_1 = arith.constant 0 : i32
    return %c0_i32, %c0_i32_0 : i32, i32
  }
  func.func @transform_3(%arg0: i32) -> (i32, i32) {
    %c0_i32 = arith.constant 0 : i32
    %c0_i32_0 = arith.constant 0 : i32
    return %arg0, %c0_i32 : i32, i32
  }
}

</mosaic_0001>

<bundles_post_ra>
// kernel: tpu_custom_call.1
= control target key start
LH: loop header
LB: loop body
LE: loop exit
PB: predicated region body
PF: predicated region fallthrough
CT: control target
= control target key end

     0   :  { %8 = vsyncpa [#allocation3], 0  ;;  %s668_s0 = inlined_call_operand.hbm [shape: f32[16,32], index: 0, kind: input, shape index: {}]   ;;  %s669_s1 = inlined_call_operand.vmem [shape: f32[1,32], index: 1, kind: input, shape index: {}]   ;;  %s670_s2 = inlined_call_operand.vmem [shape: f32[1,32], index: 2, kind: input, shape index: {}]   ;;  %s671_s3 = inlined_call_operand.hbm [shape: f32[16,32], index: 3, kind: output, shape index: {}]  }
   0x1   :  { %10 = vsyncpa [#allocation3 + $0x1], 0 }
   0x2   :  { %11 = vsyncpa [#allocation4], 0 }
   0x3   :  { %13 = vsyncpa [#allocation4 + $0x1], 0  ;;  %s494_s12 = smov 0   ;;  %s496_s13 = smov 0  }
   0x4   :  { %s498_s14 = smov 0   ;;  %s500_s15 = smov 0  }
   0x5 LB: > { %s515_s16 = sadd.s32 4294967295, %s470_s15   ;;  %s310_s17 = sadd.s32 4294967294, %s470_s15   ;;  %s470_s15 = sphi %s500_s15, %s686_s15   ;;  %s466_s14 = sphi %s498_s14, %s685_s14   ;;  %s462_s13 = sphi %s496_s13, %s684_s13   ;;  %s458_s12 = sphi %s494_s12, %s683_s12  }
   0x6   : > { %s519_s18 = sadd.s32 1, %s470_s15   ;;  %s26_s19 = sadd.s32 1, %s466_s14 }
   0x7   : > { %s23_s20 = ssub.s32 %s470_s15, %s519_s18  ;;  %p33_p0 = scmp.ne.s32.totalorder %s466_s14, %s462_s13 }
   0x8   : > { %p24_p1 = scmp.eq.s32.totalorder %s23_s20, 0  ;;  %p34_p2 = scmp.eq.s32.totalorder %s470_s15, 0 }
   0x9   : > { %p39_p3 = scmp.ne.s32.totalorder %s462_s13, %s458_s12  ;;  %p40_p4 = scmp.eq.s32.totalorder %s515_s16, 0 }
   0xa   : > { %s531_s21 = scalar_select %p24_p1, %s466_s14, %s26_s19  }
   0xb   : > { %p533_p5 = por %p34_p2, %p33_p0  ;;  %p537_p6 = por %p40_p4, %p39_p3 }
   0xc   : > { %p105_p7 = scmp.eq.s32.totalorder %s515_s16, 1  ;;  %p111_p8 = scmp.eq.s32.totalorder %s310_s17, 1 }
   0xd   : > { %p336_p10 = scmp.lt.s32.totalorder %s470_s15, 2  ;;  %s137_s26 = sand.u32 1, %s466_s14  }
   0xe   : > { %p544_p11 = por %p105_p7, %p33_p0  ;;  %p548_p12 = por %p111_p8, %p39_p3 }
   0xf   : > { %s314_s27 = sshll.u32 %s470_s15, 7  ;;  %s313_s28 = sshll.u32 %s137_s26, 3 }
  0x10   : > { %s675_s24 = scalar_select %p544_p11, 1, 0 }
  0x11   : > { %s676_s25 = scalar_select %p548_p12, 1, 0 }
  0x12   : > { %s557_s4 = scalar_lea.hbm %s668_s0, %s314_s27  ;;  %s141_s5 = scalar_lea.vmem [#allocation2], %s313_s28 }
  0x13   : > { %s148_s6 = sshll.u32 %s141_s5, 4  ;;  %p561_p13 = pnand %p336_p10, %p533_p5  ;;  %s565_s6 = int_to_ptr.vmem [resolvable:$true] %s148_s6 }
  0x14   : > { %s138_s8 = scalar_lea.sflag [#allocation3], %s137_s26  ;;  %s374_s9 = scalar_lea.hbm %s557_s4, 128 }
  0x15   : > { %p375_p2 = scmp.ne.s32.totalorder %s557_s4, %s374_s9  ;;  %p376_p3 = pneg %p561_p13 }
  0x16   : > { %s379_s17 = scalar_lea.hbm %s668_s0, 256  ;;  %p380_p5 = scmp.lt.u32.totalorder %s557_s4, %s668_s0 }
  0x17   : > { %p377_p4 = pnand %p376_p3, %p375_p2  ;;  %p381_p8 = scmp.lt.u32.totalorder %s379_s17, %s374_s9 }
  0x18   : > { %p383_p9 = scmp.lt.u32.totalorder %s374_s9, %s557_s4 }
  0x19   : > { %p378_p7 = pneg %p377_p4  ;;  %p382_p10 = por %p381_p8, %p380_p5 }
  0x1b   : > { %p384_p0 = por %p383_p9, %p382_p10 }
  0x1d   : > { %p385_p1 = pnand %p384_p0, %p378_p7 }
  0x1f   : > { %388 = shalt.err (!%p385_p1)
}
  0x20   : > { %s389_s22 = scalar_lea.vmem %s565_s6, 128  ;;  %s472_s26 = smov [#allocation2]  }
  0x21   : > { %p390_p2 = scmp.ne.s32.totalorder %s565_s6, %s389_s22  ;;  %s394_s27 = sshll.u32 %s472_s26, 4  ;;  %s395_s27 = int_to_ptr.vmem [resolvable:$false] %s394_s27 }
  0x22   : > { %s396_s28 = scalar_lea.vmem %s395_s27, 256  ;;  %p397_p11 = scmp.lt.s32.totalorder %s565_s6, %s395_s27 }
  0x23   : > { %p392_p4 = pnand %p390_p2, %p376_p3  ;;  %p398_p5 = scmp.lt.s32.totalorder %s396_s28, %s389_s22 }
  0x25   : > { %p393_p12 = pneg %p392_p4  ;;  %p399_p8 = por %p398_p5, %p397_p11 }
  0x27   : > { %p400_p9 = pnand %p399_p8, %p393_p12 }
  0x29   : > { %403 = shalt.err (!%p400_p9)
}
  0x2a   : > { %331 = dma.hbm_to_vmem [thread:$0]  (!%p561_p13), %s557_s4, 128, %s565_s6, %s138_s8  }
  0x2b   : > { %p678_p0 = scmp.lt.s32.totalorder %s470_s15, 3  ;;  %p679_p1 = scmp.ge.s32.totalorder %s470_s15, 1 }
  0x2d   : > { %p154_p3 = pnand %p679_p1, %p678_p0 }
  0x2e   : > { %s599_s29 = sand.u32 (!%p154_p3), 1, %s462_s13  }
  0x2f   : > { %157 = sbr.rel (%p154_p3) target bundleno = 398 (0x18e), region = 32  ;;  %s316_s30 = sshll.u32 (!%p154_p3), %s599_s29, 3 }
  0x30   : > { %s160_s5 = scalar_lea.sflag (!%p154_p3), [#allocation3], %s599_s29  ;;  %s163_s7 = scalar_lea.vmem (!%p154_p3), [#allocation2], %s316_s30 }
  0x36   : > { %449 = dma.done.wait (%p537_p6), %s160_s5, 128  }
  0x37   : > { %451 = vsyncadd (%p537_p6), %s160_s5, 4294967168  ;;  %vm187_vm0 = vcmask 261120   ;;  %v186_v0 = vld [vmem:[%s163_s7] sm:$0xff]  ;;  %s321_s9 = sshll.u32 %s515_s16, 7  ;;  %s185_s10 = scalar_lea.vmem [#allocation5], %s316_s30 }
  0x38   : > { %v188_v1 = vsel %vm187_vm0, %v186_v0, 0.0  ;;  %v318_v16 = vld [vmem:[%s669_s1] ss:$0 sm:$0xff]  ;;  %s240_s11 = sshll.u32 %s185_s10, 4  ;;  %s623_s20 = scalar_lea.hbm %s671_s3, %s321_s9  ;;  %s625_s11 = int_to_ptr.vmem [resolvable:$true] %s240_s11 }
  0x39   : > { %189 = vadd.xlane.f32.xlu0 %v188_v1  ;;  %v319_v18 = vld [vmem:[%s670_s2] ss:$0 sm:$0xff]  ;;  %s227_s22 = scalar_lea.sflag [#allocation4], %s599_s29  ;;  %s404_s26 = scalar_lea.vmem %s625_s11, 128 }
  0x3a   : > { %p405_p6 = scmp.ne.s32.totalorder %s625_s11, %s404_s26  ;;  %p680_p11 = scmp.ne.s32.totalorder %s675_s24, 0 }
  0x3b   : > { %s473_s16 = smov [#allocation5]  }
  0x3c   : > { %p406_p12 = pnand %p405_p6, %p680_p11  ;;  %s408_s27 = sshll.u32 %s473_s16, 4  ;;  %s409_s27 = int_to_ptr.vmem [resolvable:$false] %s408_s27 }
  0x3d   : > { %s410_s28 = scalar_lea.vmem %s409_s27, 256  ;;  %p411_p7 = scmp.lt.s32.totalorder %s625_s11, %s409_s27 }
  0x3e   : > { %p407_p13 = pneg %p406_p12  ;;  %p412_p10 = scmp.lt.s32.totalorder %s410_s28, %s404_s26 }
  0x40   : > { %p413_p2 = por %p412_p10, %p411_p7 }
  0x42   : > { %p414_p4 = pnand %p413_p2, %p407_p13 }
  0xc6   : > { %v190_v2 = vpop.xlane.xlu0 %189 }
  0xc7   : > { %v192_v3 = vmul.f32 0.03125, %v190_v2 }
  0xc9   : > { %v193_v4 = vsub.f32 %v186_v0, %v192_v3 }
  0xcb   : > { %v194_v5 = vmul.f32 %v193_v4, %v193_v4 }
  0xcd   : > { %v195_v6 = vsel %vm187_vm0, %v194_v5, 0.0 }
  0xce   : > { %196 = vadd.xlane.f32.xlu0 %v195_v6 }
 0x15b   : > { %v197_v7 = vpop.xlane.xlu0 %196 }
 0x15c   : > { %v198_v8 = vmul.f32 0.032258064, %v197_v7 }
 0x15e   : > { %370 = vrsqrt.f32 %v198_v8  ;;  %vm201_vm1 = vcmp.eq.f32.partialorder %v198_v8, inf  ;;  %v204_v11 = vand.u32 2147483648, %v198_v8  ;;  %vm203_vm2 = vcmp.eq.f32.partialorder %v198_v8, 0.0 }
 0x168   : > { %v371_v9 = vpop.eup %370 }
 0x169   : > { %v200_v10 = vmul.f32 %v371_v9, %v198_v8 }
 0x16b   : > { %v202_v12 = vsel %vm201_vm1, %v198_v8, %v200_v10 }
 0x16c   : > { %v205_v13 = vsel %vm203_vm2, %v204_v11, %v202_v12 }
 0x16d   : > { %v206_v14 = vadd.f32 1e-06, %v205_v13 }
 0x16f   : > { %372 = vrcp.f32 %v206_v14 }
 0x179   : > { %v373_v15 = vpop.eup %372 }
 0x17a   : > { %v210_v17 = vmul.f32 %v373_v15, %v193_v4 }
 0x17c   : > { %v217_v19 = vmul.f32 %v318_v16, %v210_v17 }
 0x17e   : > { %v224_v20 = vadd.f32 %v319_v18, %v217_v19 }
 0x180   : > { %225 = vst.msk [vmem:[%s185_s10] sm:$0xff] %vm187_vm0, %v224_v20 }
 0x181   : > { %417 = shalt.err (!%p414_p4)
}
 0x182   : > { %s418_s29 = scalar_lea.hbm %s623_s20, 128  ;;  %s422_s7 = scalar_lea.hbm %s671_s3, 256 }
 0x183   : > { %p419_p5 = scmp.ne.s32.totalorder %s623_s20, %s418_s29  ;;  %p423_p0 = scmp.lt.u32.totalorder %s623_s20, %s671_s3 }
 0x184   : > { %p424_p1 = scmp.lt.u32.totalorder %s422_s7, %s418_s29  ;;  %p426_p6 = scmp.lt.u32.totalorder %s418_s29, %s623_s20 }
 0x185   : > { %p420_p8 = pnand %p419_p5, %p680_p11 }
 0x186   : > { %p425_p3 = por %p424_p1, %p423_p0 }
 0x187   : > { %p421_p9 = pneg %p420_p8 }
 0x188   : > { %p427_p12 = por %p426_p6, %p425_p3 }
 0x18a   : > { %p428_p13 = pnand %p427_p12, %p421_p9 }
 0x18c   : > { %431 = shalt.err (!%p428_p13)
}
 0x18d   : > { %326 = dma.vmem_to_hbm [thread:$0]  (%p680_p11), %s625_s11, 128, %s623_s20, %s227_s22  }
 0x18e PF: > { %s252_s6 = sand.u32 1, %s458_s12   ;;  %p681_p7 = scmp.ne.s32.totalorder %s676_s25, 0 }
 0x18f   : > { %p682_p10 = scmp.ge.s32.totalorder %s470_s15, 2  ;;  %s253_s8 = scalar_lea.sflag [#allocation4], %s252_s6 }
 0x191   : > { %p333_p2 = pnand %p682_p10, %p681_p7 }
 0x193   : > { %453 = dma.done.wait (!%p333_p2), %s253_s8, 128  }
 0x194   : > { %455 = vsyncadd (!%p333_p2), %s253_s8, 4294967168  ;;  %p16_p4 = scmp.ge.s32.totalorder %s519_s18, 4   ;;  %s683_s12 = smov %s462_s13 }
 0x195   : > { %s684_s13 = smov %s466_s14  ;;  %s685_s14 = smov %s531_s21 }
 0x196   : > { %s686_s15 = smov %s519_s18  ;;  %18 = sbr.rel (!%p16_p4) target bundleno = 5 (0x5), region = 77 }
 0x19d   :  { %258 = vsyncpa [#allocation3], 1 }
 0x19e   :  { %260 = vsyncpa [#allocation3 + $0x1], 1 }
 0x19f   :  { %261 = vsyncpa [#allocation4], 1 }
 0x1a0   :  { %263 = vsyncpa [#allocation4 + $0x1], 1 }

</bundles_post_ra>
